<compile_context>
chip_gen: v5e
topology: v5e:2x2
jax: 0.10.0
libtpu: 0.0.40
codegen_flags: <defaults>
</compile_context>

<pallas_src>
import jax
import jax.numpy as jnp
import numpy as np
from jax import lax
from jax.experimental import pallas as pl
from jax.experimental.pallas import tpu as pltpu

BN_EPS = 1e-5
_TB_CAP = 1024   # rows per grid step; multiple of 128 so large-B tiles are lane-aligned


def _round_up(x, m):
    return ((x + m - 1) // m) * m


def _pick_tiles(B, tb=None):
    """Batch tile TB and padded batch Bp (TB | Bp, TB multiple of 16)."""
    if tb is not None:
        assert tb % 8 == 0, "explicit tile size must be a multiple of 8"
        TB = tb
    elif B <= _TB_CAP:
        TB = _round_up(B, 16)           # single fused step (launch-bound regime)
    else:
        TB = _TB_CAP                    # streamed, lane-aligned tiles
    Bp = _round_up(B, TB)
    return TB, Bp


# ---------------------------------------------------------------------------
# Fused kernel: mix + Linear(D->C) per batch tile, BN(full batch) + Sigmoid at
# the last grid step.  Logits are kept class-major (C, TB): batch on lanes.
# ---------------------------------------------------------------------------
def _wsd_fused_kernel(w_ref, n_ref, v1_ref, v2_ref, fcw_ref, fcb_ref,
                      gamma_ref, beta_ref, out_ref, z_acc):
    i = pl.program_id(0)

    # Fold cat(v1-v2, v2-v1, v1, v2) @ W into two scalar coefficients (SMEM,
    # scalar ALU — free): c = a*v1 + b*v2.
    a = w_ref[0] - w_ref[1] + w_ref[2]
    b = w_ref[1] - w_ref[0] + w_ref[3]

    v1 = v1_ref[...].astype(jnp.float32)          # (TB, D), native dtype in
    v2 = v2_ref[...].astype(jnp.float32)
    c = v1 * a + v2 * b                           # 2 mul + 1 add on the VPU

    # Class-major logits (C, TB): contract over D with fc weight in its native
    # lane-dense (C, D) layout.  Batch lands on the lane axis.
    z = lax.dot_general(fcw_ref[...], c, (((1,), (1,)), ((), ())),
                        preferred_element_type=jnp.float32)    # (C, TB)
    z_acc[i] = z + fcb_ref[...]                   # fcb (C, 1) broadcast over lanes

    # Final step: BatchNorm1d (training-mode batch stats, biased var) + Sigmoid
    # over the full batch, masking out padded rows.
    @pl.when(i == pl.num_programs(0) - 1)
    def _():
        zf = z_acc[...]                           # (G, C, TB)
        G, C, TB = zf.shape
        n_valid = n_ref[0]
        n_f = n_valid.astype(jnp.float32)
        col = (lax.broadcasted_iota(jnp.int32, zf.shape, 0) * TB
               + lax.broadcasted_iota(jnp.int32, zf.shape, 2))
        valid = col < n_valid

        zm = jnp.where(valid, zf, 0.0)
        mean = jnp.sum(zm, axis=(0, 2), keepdims=True) / n_f          # (1, C, 1)
        diff = jnp.where(valid, zf - mean, 0.0)
        var = jnp.sum(diff * diff, axis=(0, 2), keepdims=True) / n_f  # biased

        zhat = (zf - mean) * lax.rsqrt(var + BN_EPS)
        gamma = gamma_ref[...].reshape(1, C, 1)
        beta = beta_ref[...].reshape(1, C, 1)
        out_ref[...] = jax.nn.sigmoid(zhat * gamma + beta)


def wsd_forward(vec1, vec2, W, fc_weight, fc_bias, bn_gamma, bn_beta, *, tb=None):
    """vec1, vec2: (B, D) f32 or bf16; W: (4, 1); fc_weight: (C, D);
    fc_bias / bn_gamma / bn_beta: (C,).  Returns (B, C) f32."""
    B, D = vec1.shape
    C = fc_weight.shape[0]
    TB, Bp = _pick_tiles(B, tb)
    G = Bp // TB

    if Bp != B:                                   # pad batch; padded rows are
        pad = ((0, Bp - B), (0, 0))               # masked out of the BN stats
        vec1 = jnp.pad(vec1, pad)
        vec2 = jnp.pad(vec2, pad)

    w_flat = W.reshape(4).astype(jnp.float32)
    n_valid = jnp.array([B], dtype=jnp.int32)
    fcw = fc_weight.astype(jnp.float32)                      # (C, D), lane-dense
    fcb = fc_bias.reshape(C, 1).astype(jnp.float32)
    gamma = bn_gamma.reshape(C, 1).astype(jnp.float32)
    beta = bn_beta.reshape(C, 1).astype(jnp.float32)

    vec_bytes = jnp.dtype(vec1.dtype).itemsize
    cost = pl.CostEstimate(
        flops=int(2 * Bp * D * C + 3 * Bp * D + 10 * Bp * C),
        transcendentals=int(Bp * C),
        bytes_accessed=int(2 * Bp * D * vec_bytes
                           + (C * D + 3 * C + 5) * 4
                           + G * C * TB * 4),
    )

    out_cm = pl.pallas_call(
        _wsd_fused_kernel,
        out_shape=jax.ShapeDtypeStruct((G, C, TB), jnp.float32),
        grid=(G,),
        in_specs=[
            pl.BlockSpec(memory_space=pltpu.MemorySpace.SMEM),   # W (4,) scalars
            pl.BlockSpec(memory_space=pltpu.MemorySpace.SMEM),   # n_valid (1,)
            pl.BlockSpec((TB, D), lambda i: (i, 0)),             # vec1 tile
            pl.BlockSpec((TB, D), lambda i: (i, 0)),             # vec2 tile
            pl.BlockSpec((C, D), lambda i: (0, 0)),              # fc weight, resident
            pl.BlockSpec((C, 1), lambda i: (0, 0)),              # fc bias, resident
            pl.BlockSpec((C, 1), lambda i: (0, 0)),              # bn gamma
            pl.BlockSpec((C, 1), lambda i: (0, 0)),              # bn beta
        ],
        # Output resident across the (sequential) batch axis; written once at
        # the final grid step.
        out_specs=pl.BlockSpec((G, C, TB), lambda i: (0, 0, 0)),
        scratch_shapes=[pltpu.VMEM((G, C, TB), jnp.float32)],    # class-major z
        compiler_params=pltpu.CompilerParams(
            dimension_semantics=("arbitrary",)),                 # BN accumulator
        cost_estimate=cost,
    )(w_flat, n_valid, vec1, vec2, fcw, fcb, gamma, beta)

    # (G, C, TB) -> (B, C): tiny wrapper-side layout plumbing, not compute.
    return out_cm.transpose(0, 2, 1).reshape(Bp, C)[:B]


def _reference(vec1, vec2, W, fc_weight, fc_bias, bn_gamma, bn_beta):
    # Pure-JAX reference mirroring the PyTorch forward (training-mode BN).
    v1 = vec1[:, None, :]
    v2 = vec2[:, None, :]
    concat = jnp.concatenate([v1 - v2, v2 - v1, v1, v2], axis=1)          # (B, 4, D)
    c = jnp.squeeze(jnp.matmul(jnp.transpose(concat, (0, 2, 1)), W), -1)  # (B, D)
    z = c @ fc_weight.T + fc_bias
    mean = jnp.mean(z, axis=0, keepdims=True)
    var = jnp.mean((z - mean) ** 2, axis=0, keepdims=True)
    y = (z - mean) / jnp.sqrt(var + BN_EPS) * bn_gamma + bn_beta
    return jax.nn.sigmoid(y)


if __name__ == "__main__":
    D = 32     # in_features (encoder hidden size; 768 in the real model)
    C = 2      # num_class

    key = jax.random.PRNGKey(0)
    k1, k2, k3, k4, k5 = jax.random.split(key, 5)

    # Parameters (deterministic synthetic init).
    # W: xavier_normal_ on shape (4, 1) -> std = sqrt(2 / (4 + 1))
    W = jax.random.normal(k3, (4, 1), dtype=jnp.float32) * np.sqrt(2.0 / 5.0)
    bound_w = 1.0 / np.sqrt(D)
    fc_weight = jax.random.uniform(k4, (C, D), jnp.float32, -bound_w, bound_w)
    fc_bias = jax.random.uniform(k5, (C,), jnp.float32, -bound_w, bound_w)
    bn_gamma = jnp.ones((C,), jnp.float32)
    bn_beta = jnp.zeros((C,), jnp.float32)

    # --- case 1: small batch, f32 embeddings, single fused step (with padding
    #             + masked BN stats, since 8 rounds up to a 16-row tile) ---
    B = 8
    vec1 = jax.random.normal(k1, (B, D), dtype=jnp.float32)
    vec2 = jax.random.normal(k2, (B, D), dtype=jnp.float32)
    out = jax.block_until_ready(
        wsd_forward(vec1, vec2, W, fc_weight, fc_bias, bn_gamma, bn_beta))
    ref = _reference(vec1, vec2, W, fc_weight, fc_bias, bn_gamma, bn_beta)
    assert out.shape == (B, C)
    assert np.allclose(np.asarray(out), np.asarray(ref), atol=1e-4, rtol=1e-4)

    # --- case 2: larger batch, bf16 embeddings, multi-step grid (exercises the
    #             class-major accumulator across 4 grid steps) ---
    B2 = 64
    kv1, kv2 = jax.random.split(jax.random.PRNGKey(1), 2)
    v1b = jax.random.normal(kv1, (B2, D), jnp.float32).astype(jnp.bfloat16)
    v2b = jax.random.normal(kv2, (B2, D), jnp.float32).astype(jnp.bfloat16)
    out2 = jax.block_until_ready(
        wsd_forward(v1b, v2b, W, fc_weight, fc_bias, bn_gamma, bn_beta, tb=16))
    ref2 = _reference(v1b.astype(jnp.float32), v2b.astype(jnp.float32),
                      W, fc_weight, fc_bias, bn_gamma, bn_beta)
    assert out2.shape == (B2, C)
    assert np.allclose(np.asarray(out2), np.asarray(ref2), atol=1e-4, rtol=1e-4)

    # TODO(synk): the XLM-RoBERTa encoder + subword tokenization in
    # _select_embedding / process_sentence are not translatable to a Pallas
    # kernel; vec1/vec2 are taken as precomputed pooled lemma embeddings.
    # TODO(synk): BN running_mean/running_var buffers are not emitted/updated
    # (forward output matches training-mode PyTorch; module state parity would
    # need two extra outputs).
    print("KERNEL_OK")
</pallas_src>

<mosaic_0001>
module attributes {stable_mosaic.version = 11 : i64} {
  func.func @_wsd_fused_kernel(%arg0: i32, %arg1: memref<4xf32, #tpu.memory_space<smem>>, %arg2: memref<1xi32, #tpu.memory_space<smem>>, %arg3: memref<16x32xf32, #tpu.memory_space<vmem>>, %arg4: memref<16x32xf32, #tpu.memory_space<vmem>>, %arg5: memref<2x32xf32, #tpu.memory_space<vmem>>, %arg6: memref<2x1xf32, #tpu.memory_space<vmem>>, %arg7: memref<2x1xf32, #tpu.memory_space<vmem>>, %arg8: memref<2x1xf32, #tpu.memory_space<vmem>>, %arg9: memref<1x2x16xf32, #tpu.memory_space<vmem>>, %arg10: memref<1x2x16xf32, #tpu.memory_space<vmem>>) attributes {dimension_semantics = [#tpu.dimension_semantics<arbitrary>], iteration_bounds = array<i64: 1>, scalar_prefetch = 0 : i64, scratch_operands = 1 : i64, tpu.core_type = #tpu.core_type<tc>, window_params = [{transform_indices = @transform_0, window_bounds = array<i64: 4>}, {transform_indices = @transform_1, window_bounds = array<i64: 1>}, {transform_indices = @transform_2, window_bounds = array<i64: 16, 32>}, {transform_indices = @transform_3, window_bounds = array<i64: 16, 32>}, {pipeline_mode = #tpu.pipeline_mode<synchronous>, transform_indices = @transform_4, window_bounds = array<i64: 2, 32>}, {pipeline_mode = #tpu.pipeline_mode<synchronous>, transform_indices = @transform_5, window_bounds = array<i64: 2, 1>}, {pipeline_mode = #tpu.pipeline_mode<synchronous>, transform_indices = @transform_6, window_bounds = array<i64: 2, 1>}, {pipeline_mode = #tpu.pipeline_mode<synchronous>, transform_indices = @transform_7, window_bounds = array<i64: 2, 1>}, {pipeline_mode = #tpu.pipeline_mode<synchronous>, transform_indices = @transform_8, window_bounds = array<i64: 1, 2, 16>}]} {
    %c0 = arith.constant 0 : index
    %0 = memref.load %arg1[%c0] : memref<4xf32, #tpu.memory_space<smem>>
    %c1 = arith.constant 1 : index
    %1 = memref.load %arg1[%c1] : memref<4xf32, #tpu.memory_space<smem>>
    %2 = arith.subf %0, %1 : f32
    %c2 = arith.constant 2 : index
    %3 = memref.load %arg1[%c2] : memref<4xf32, #tpu.memory_space<smem>>
    %4 = arith.addf %2, %3 : f32
    %c1_0 = arith.constant 1 : index
    %5 = memref.load %arg1[%c1_0] : memref<4xf32, #tpu.memory_space<smem>>
    %c0_1 = arith.constant 0 : index
    %6 = memref.load %arg1[%c0_1] : memref<4xf32, #tpu.memory_space<smem>>
    %7 = arith.subf %5, %6 : f32
    %c3 = arith.constant 3 : index
    %8 = memref.load %arg1[%c3] : memref<4xf32, #tpu.memory_space<smem>>
    %9 = arith.addf %7, %8 : f32
    %c0_2 = arith.constant 0 : index
    %c0_3 = arith.constant 0 : index
    %10 = vector.load %arg3[%c0_2, %c0_3] : memref<16x32xf32, #tpu.memory_space<vmem>>, vector<16x32xf32>
    %c0_4 = arith.constant 0 : index
    %c0_5 = arith.constant 0 : index
    %11 = vector.load %arg4[%c0_4, %c0_5] : memref<16x32xf32, #tpu.memory_space<vmem>>, vector<16x32xf32>
    %12 = vector.broadcast %4 : f32 to vector<16x32xf32>
    %13 = arith.mulf %10, %12 : vector<16x32xf32>
    %14 = vector.broadcast %9 : f32 to vector<16x32xf32>
    %15 = arith.mulf %11, %14 : vector<16x32xf32>
    %16 = arith.addf %13, %15 : vector<16x32xf32>
    %c0_6 = arith.constant 0 : index
    %c0_7 = arith.constant 0 : index
    %17 = vector.load %arg5[%c0_6, %c0_7] : memref<2x32xf32, #tpu.memory_space<vmem>>, vector<2x32xf32>
    %cst = arith.constant dense<0.000000e+00> : vector<2x16xf32>
    %18 = tpu.matmul %17, %16, %cst {dimension_numbers = #tpu.dot_dimension_numbers<[1], [1], [0], [0], [0, 0, 1, 0], [], []>} : vector<2x32xf32>, vector<16x32xf32>, vector<2x16xf32> -> vector<2x16xf32>
    %c0_8 = arith.constant 0 : index
    %c0_9 = arith.constant 0 : index
    %19 = vector.load %arg6[%c0_8, %c0_9] : memref<2x1xf32, #tpu.memory_space<vmem>>, vector<2x1xf32>
    %20 = vector.broadcast %19 : vector<2x1xf32> to vector<2x16xf32>
    %21 = arith.addf %18, %20 : vector<2x16xf32>
    %22 = arith.index_cast %arg0 : i32 to index
    %c0_10 = arith.constant 0 : index
    %c0_11 = arith.constant 0 : index
    %23 = vector.load %arg10[%22, %c0_10, %c0_11] : memref<1x2x16xf32, #tpu.memory_space<vmem>>, vector<1x2x16xf32>
    %24 = vector.shape_cast %23 : vector<1x2x16xf32> to vector<2x16xf32>
    %25 = vector.shape_cast %21 : vector<2x16xf32> to vector<1x2x16xf32>
    tpu.vector_store %arg10[%22, %c0_10, %c0_11], %25 {strides = array<i32>} : memref<1x2x16xf32, #tpu.memory_space<vmem>>, vector<1x2x16xf32>,
    %c0_i32 = arith.constant 0 : i32
    %26 = arith.cmpi eq, %arg0, %c0_i32 : i32
    %27 = arith.extui %26 : i1 to i32
    %c0_i32_12 = arith.constant 0 : i32
    %28 = arith.cmpi ne, %27, %c0_i32_12 : i32
    scf.if %28 {
      %c0_13 = arith.constant 0 : index
      %c0_14 = arith.constant 0 : index
      %c0_15 = arith.constant 0 : index
      %29 = vector.load %arg10[%c0_13, %c0_14, %c0_15] : memref<1x2x16xf32, #tpu.memory_space<vmem>>, vector<1x2x16xf32>
      %c0_16 = arith.constant 0 : index
      %30 = memref.load %arg2[%c0_16] : memref<1xi32, #tpu.memory_space<smem>>
      %31 = arith.sitofp %30 : i32 to f32
      %32 = tpu.iota {dimensions = array<i32: 0>} : vector<1x2x16xi32>
      %c16_i32 = arith.constant 16 : i32
      %33 = vector.broadcast %c16_i32 : i32 to vector<1x2x16xi32>
      %34 = arith.muli %32, %33 : vector<1x2x16xi32>
      %35 = tpu.iota {dimensions = array<i32: 2>} : vector<1x2x16xi32>
      %36 = arith.addi %34, %35 : vector<1x2x16xi32>
      %37 = vector.broadcast %30 : i32 to vector<1x2x16xi32>
      %38 = arith.cmpi slt, %36, %37 : vector<1x2x16xi32>
      %cst_17 = arith.constant 0.000000e+00 : f32
      %39 = vector.broadcast %cst_17 : f32 to vector<1x2x16xf32>
      %40 = arith.select %38, %29, %39 : vector<1x2x16xi1>, vector<1x2x16xf32>
      %cst_18 = arith.constant dense<0.000000e+00> : vector<2xf32>
      %41 = vector.multi_reduction <add>, %40, %cst_18 [0, 2] : vector<1x2x16xf32> to vector<2xf32>
      %42 = vector.shape_cast %41 : vector<2xf32> to vector<1x2x1xf32>
      %43 = vector.broadcast %31 : f32 to vector<1x2x1xf32>
      %44 = arith.divf %42, %43 : vector<1x2x1xf32>
      %45 = vector.broadcast %44 : vector<1x2x1xf32> to vector<1x2x16xf32>
      %46 = arith.subf %29, %45 : vector<1x2x16xf32>
      %cst_19 = arith.constant 0.000000e+00 : f32
      %47 = vector.broadcast %cst_19 : f32 to vector<1x2x16xf32>
      %48 = arith.select %38, %46, %47 : vector<1x2x16xi1>, vector<1x2x16xf32>
      %49 = arith.mulf %48, %48 : vector<1x2x16xf32>
      %cst_20 = arith.constant dense<0.000000e+00> : vector<2xf32>
      %50 = vector.multi_reduction <add>, %49, %cst_20 [0, 2] : vector<1x2x16xf32> to vector<2xf32>
      %51 = vector.shape_cast %50 : vector<2xf32> to vector<1x2x1xf32>
      %52 = vector.broadcast %31 : f32 to vector<1x2x1xf32>
      %53 = arith.divf %51, %52 : vector<1x2x1xf32>
      %54 = vector.broadcast %44 : vector<1x2x1xf32> to vector<1x2x16xf32>
      %55 = arith.subf %29, %54 : vector<1x2x16xf32>
      %cst_21 = arith.constant 9.99999974E-6 : f32
      %56 = vector.broadcast %cst_21 : f32 to vector<1x2x1xf32>
      %57 = arith.addf %53, %56 : vector<1x2x1xf32>
      %58 = math.rsqrt %57 : vector<1x2x1xf32>
      %59 = vector.broadcast %58 : vector<1x2x1xf32> to vector<1x2x16xf32>
      %60 = arith.mulf %55, %59 : vector<1x2x16xf32>
      %c0_22 = arith.constant 0 : index
      %c0_23 = arith.constant 0 : index
      %61 = vector.load %arg7[%c0_22, %c0_23] : memref<2x1xf32, #tpu.memory_space<vmem>>, vector<2x1xf32>
      %62 = vector.shape_cast %61 : vector<2x1xf32> to vector<1x2x1xf32>
      %c0_24 = arith.constant 0 : index
      %c0_25 = arith.constant 0 : index
      %63 = vector.load %arg8[%c0_24, %c0_25] : memref<2x1xf32, #tpu.memory_space<vmem>>, vector<2x1xf32>
      %64 = vector.shape_cast %63 : vector<2x1xf32> to vector<1x2x1xf32>
      %65 = vector.broadcast %62 : vector<1x2x1xf32> to vector<1x2x16xf32>
      %66 = arith.mulf %60, %65 : vector<1x2x16xf32>
      %67 = vector.broadcast %64 : vector<1x2x1xf32> to vector<1x2x16xf32>
      %68 = arith.addf %66, %67 : vector<1x2x16xf32>
      %69 = arith.negf %68 : vector<1x2x16xf32>
      %70 = math.exp %69 : vector<1x2x16xf32>
      %cst_26 = arith.constant 1.000000e+00 : f32
      %71 = vector.broadcast %cst_26 : f32 to vector<1x2x16xf32>
      %72 = arith.addf %71, %70 : vector<1x2x16xf32>
      %73 = arith.divf %71, %72 : vector<1x2x16xf32>
      %c0_27 = arith.constant 0 : index
      %c0_28 = arith.constant 0 : index
      %c0_29 = arith.constant 0 : index
      %74 = vector.load %arg9[%c0_27, %c0_28, %c0_29] : memref<1x2x16xf32, #tpu.memory_space<vmem>>, vector<1x2x16xf32>
      tpu.vector_store %arg9[%c0_27, %c0_28, %c0_29], %73 {strides = array<i32>} : memref<1x2x16xf32, #tpu.memory_space<vmem>>, vector<1x2x16xf32>,
    } else {
    }
    return
  }
  func.func @transform_0(%arg0: i32) -> i32 {
    %c0_i32 = arith.constant 0 : i32
    %c0_i32_0 = arith.constant 0 : i32
    return %c0_i32 : i32
  }
  func.func @transform_1(%arg0: i32) -> i32 {
    %c0_i32 = arith.constant 0 : i32
    %c0_i32_0 = arith.constant 0 : i32
    return %c0_i32 : i32
  }
  func.func @transform_2(%arg0: i32) -> (i32, i32) {
    %c0_i32 = arith.constant 0 : i32
    %c0_i32_0 = arith.constant 0 : i32
    return %arg0, %c0_i32 : i32, i32
  }
  func.func @transform_3(%arg0: i32) -> (i32, i32) {
    %c0_i32 = arith.constant 0 : i32
    %c0_i32_0 = arith.constant 0 : i32
    return %arg0, %c0_i32 : i32, i32
  }
  func.func @transform_4(%arg0: i32) -> (i32, i32) {
    %c0_i32 = arith.constant 0 : i32
    %c0_i32_0 = arith.constant 0 : i32
    %c0_i32_1 = arith.constant 0 : i32
    return %c0_i32, %c0_i32_0 : i32, i32
  }
  func.func @transform_5(%arg0: i32) -> (i32, i32) {
    %c0_i32 = arith.constant 0 : i32
    %c0_i32_0 = arith.constant 0 : i32
    %c0_i32_1 = arith.constant 0 : i32
    return %c0_i32, %c0_i32_0 : i32, i32
  }
  func.func @transform_6(%arg0: i32) -> (i32, i32) {
    %c0_i32 = arith.constant 0 : i32
    %c0_i32_0 = arith.constant 0 : i32
    %c0_i32_1 = arith.constant 0 : i32
    return %c0_i32, %c0_i32_0 : i32, i32
  }
  func.func @transform_7(%arg0: i32) -> (i32, i32) {
    %c0_i32 = arith.constant 0 : i32
    %c0_i32_0 = arith.constant 0 : i32
    %c0_i32_1 = arith.constant 0 : i32
    return %c0_i32, %c0_i32_0 : i32, i32
  }
  func.func @transform_8(%arg0: i32) -> (i32, i32, i32) {
    %c0_i32 = arith.constant 0 : i32
    %c0_i32_0 = arith.constant 0 : i32
    %c0_i32_1 = arith.constant 0 : i32
    %c0_i32_2 = arith.constant 0 : i32
    return %c0_i32, %c0_i32_0, %c0_i32_1 : i32, i32, i32
  }
}

</mosaic_0001>

<bundles_post_ra>
// kernel: tpu_custom_call.1
= control target key start
LH: loop header
LB: loop body
LE: loop exit
PB: predicated region body
PF: predicated region fallthrough
CT: control target
= control target key end

     0   :  { %14 = vsyncpa [#allocation7], 0  ;;  %s451_s0 = inlined_call_operand.vmem [shape: f32[4], index: 0, kind: input, shape index: {}]   ;;  %s452_s1 = inlined_call_operand.<no memory space> [shape: s32[1], index: 1, kind: input, shape index: {}]   ;;  %s453_s2 = inlined_call_operand.hbm [shape: f32[16,32], index: 2, kind: input, shape index: {}]   ;;  %s454_s3 = inlined_call_operand.hbm [shape: f32[16,32], index: 3, kind: input, shape index: {}]   ;;  %s455_s4 = inlined_call_operand.vmem [shape: f32[2,32], index: 4, kind: input, shape index: {}]   ;;  %s456_s5 = inlined_call_operand.vmem [shape: f32[2,1], index: 5, kind: input, shape index: {}]   ;;  %s457_s6 = inlined_call_operand.vmem [shape: f32[2,1], index: 6, kind: input, shape index: {}]   ;;  %s458_s7 = inlined_call_operand.vmem [shape: f32[2,1], index: 7, kind: input, shape index: {}]   ;;  %s459_s8 = inlined_call_operand.hbm [shape: f32[1,2,16], index: 8, kind: output, shape index: {}]  }
   0x1   :  { %15 = vsyncpa [#allocation5], 0 }
   0x2   :  { %16 = vsyncpa [#allocation10], 0 }
   0x3   :  { %17 = vsyncpa [#allocation6], 0  ;;  %s23_s29 = sshll.u32 %s451_s0, 4  ;;  %s33_s10 = sshll.u32 %s453_s2, 4  ;;  %s24_s29 = int_to_ptr.vmem [resolvable:$true] %s23_s29  ;;  %s34_s10 = int_to_ptr.hbm [resolvable:$true] %s33_s10 }
   0x4   :  { %s357_s11 = smov [#allocation4]   ;;  %s358_s12 = smov [#allocation8]  }
   0x5   :  { %26 = dma.vmem_to_smem %s24_s29, 16, %s357_s11, [#allocation7]  }
   0x6   :  { %s35_s13 = sshll.u32 %s358_s12, 4  ;;  %s359_s14 = smov 128   ;;  %s36_s13 = int_to_ptr.vmem [resolvable:$true] %s35_s13 }
   0x7   :  { %s360_s15 = smov 8   ;;  %s46_s18 = sshll.u32 %s454_s3, 4  ;;  %s47_s18 = int_to_ptr.hbm [resolvable:$true] %s46_s18 }
   0x8   :  { %41 = dma.hbm_to_vmem [thread:$0]  %s34_s10, 256, %s36_s13, [#allocation5], %s359_s14, %s359_s14, %s360_s15  }
   0x9   :  { %s361_s0 = smov [#allocation9]  }
   0xa   :  { %s48_s19 = sshll.u32 %s361_s0, 4  ;;  %s49_s19 = int_to_ptr.vmem [resolvable:$true] %s48_s19 }
   0xb   :  { %54 = dma.hbm_to_vmem [thread:$0]  %s47_s18, 256, %s49_s19, [#allocation10], %s359_s14, %s359_s14, %s360_s15  }
   0xc   :  { %349 = dma.done.wait [#allocation7], 16  }
   0xd   :  { %350 = vsyncadd [#allocation7], 4294967280 }
   0xe   :  { %351 = dma.done.wait [#allocation5], 256  }
   0xf   :  { %352 = vsyncadd [#allocation5], 4294967040 }
  0x10   :  { %353 = dma.done.wait [#allocation10], 256  }
  0x11   :  { %354 = vsyncadd [#allocation10], 4294967040 }
  0x12   :  { %75 = sfence }
  0x13   :  { %s76_s2 = sld [smem:[#allocation4]]  ;;  %v362_v0 = vmov 0   ;;  %v97_v1 = vld [vmem:[%s456_s5] sm:$0x3]  ;;  %v85_v2 = vld [vmem:[#allocation8 + $0x8] sm:$0xff]  ;;  %v84_v3 = vld [vmem:[#allocation8] sm:$0xff]  ;;  %v144_v17 = vlaneseq  ;;  %v146_v20 = vstv %s452_s1  ;;  %s143_s10 = scvt.s32.f32 %s452_s1 }
  0x14   :  { %s240_s20 = sld [smem:[#allocation4 + $0x1]]  ;;  %254 = vset.pattern.permute.xlu0 %v362_v0  ;;  %255 = vset.pattern.permute.xlu1 %v362_v0  ;;  %v86_v4 = vld [vmem:[#allocation9] sm:$0xff]  ;;  %v87_v5 = vld [vmem:[#allocation9 + $0x8] sm:$0xff]  ;;  %vm103_vm0 = vcmask 261120   ;;  %vm135_vm1 = vcmask 123904   ;;  %s228_s16 = sshll.u32 %s459_s8, 4  ;;  %s229_s16 = int_to_ptr.hbm [resolvable:$true] %s228_s16 }
  0x15   :  { %s241_s21 = sld [smem:[#allocation4 + $0x2]]  ;;  %100 = vperm.xlu0 %254, %v97_v1   ;;  %256 = vset.pattern.permute.xlu2 %v362_v0  ;;  %v96_v14 = vld [vmem:[%s455_s4] sm:$0x3]  ;;  %v145_v19 = vand.u32 127, %v144_v17  ;;  %v152_v25 = vstv %s143_s10 }
  0x16   :  { %s242_s3 = sld [smem:[#allocation4 + $0x3]]  ;;  %257 = vrcp.f32 %v152_v25  ;;  %vm158_vm3 = vweird.f32 %v152_v25  ;;  %v164_v30 = vand.u32 2147483648, %v152_v25  ;;  %v162_v32 = vand.u32 2147483647, %v152_v25  ;;  %v188_v38 = vld [vmem:[%s458_s7] sm:$0x3] }
  0x17   :  { %vm428_vm2 = vcmp.lt.s32.totalorder %v145_v19, %v146_v20  ;;  %197 = vperm.xlu2 %256, %v188_v38   ;;  %v187_v43 = vld [vmem:[%s457_s6] sm:$0x3]  ;;  %s363_s6 = smov [#allocation11]  }
  0x18   :  { %v165_v33 = vor.u32 1.1754944e-38, %v164_v30  ;;  %vm163_vm6 = vcmp.eq.f32.partialorder %v162_v32, 8.507059e+37  ;;  %s226_s7 = sshll.u32 %s363_s6, 4  ;;  %s227_s7 = int_to_ptr.vmem [resolvable:$true] %s226_s7 }
  0x1a   :  { %s78_s24 = ssub.f32 %s76_s2, %s240_s20 }
  0x1b   :  { %s81_s25 = ssub.f32 %s240_s20, %s76_s2 }
  0x1c   :  { %s80_s26 = sadd.f32 %s241_s21, %s78_s24  ;;  %v258_v26 = vpop.eup %257 }
  0x1d   :  { %s83_s27 = sadd.f32 %s242_s3, %s81_s25  ;;  %v154_v27 = vmul.f32 %v258_v26, %v152_v25  ;;  %vm159_vm4 = vweird.f32 %v258_v26 }
  0x1e   :  { %v88_v6 = vstv %s80_s26  ;;  %vm160_vm5 = vmor %vm158_vm3, %vm159_vm4 }
  0x1f   :  { %v90_v7 = vmul.f32 %v88_v6, %v85_v2  ;;  %v91_v8 = vstv %s83_s27  ;;  %v89_v9 = vmul.f32 %v88_v6, %v84_v3  ;;  %v155_v28 = vsub.f32 1.0, %v154_v27 }
  0x20   :  { %v92_v10 = vmul.f32 %v91_v8, %v86_v4  ;;  %v93_v11 = vmul.f32 %v91_v8, %v87_v5 }
  0x21   :  { %v156_v29 = vmul.f32 %v258_v26, %v155_v28 }
  0x22   :  { %v95_v12 = vadd.f32 %v93_v11, %v90_v7  ;;  %v94_v13 = vadd.f32 %v92_v10, %v89_v9 }
  0x23   :  { %v157_v31 = vadd.f32 %v258_v26, %v156_v29 }
  0x24   :  { %243 = vmatpush.xpose.msk.msra.mxu0 %vm103_vm0, %v95_v12 }
  0x25   :  { %v161_v34 = vsel %vm160_vm5, %v258_v26, %v157_v31 }
  0x26   :  { %v166_v35 = vsel %vm163_vm6, %v165_v33, %v161_v34 }
  0x28   :  { %244 = vmatpush.xpose.msk.msra.mxu0 %vm103_vm0, %v94_v13 }
  0x2b   :  { %245 = vmatmul.msk.f32.vlgmr.msra.gmra.mxu0 %vm103_vm0, %v96_v14 }
  0x71   :  { %v198_v56 = vpop.permute.xlu2 %197 }
  0x87   :  { %v101_v15 = vpop.permute.xlu0 %100 }
  0xa8   :  { %v130_v16 = vpop.f32.mrf.mxu0 }
  0xa9   :  { %v131_v18 = vadd.f32 %v130_v16, %v101_v15 }
  0xab   :  { %136 = vst.msk [vmem:[#allocation2] sm:$0x3] %vm135_vm1, %v131_v18 }
  0xb2   :  { %v141_v22 = vld [vmem:[#allocation2] sm:$0x3] }
  0xb3   :  { %v148_v23 = vsel %vm428_vm2, %v141_v22, 0.0 }
  0xb4   :  { %v149_v24 = vsel %vm135_vm1, %v148_v23, 0.0 }
  0xb5   :  { %150 = vadd.xlane.f32.xlu0 %v149_v24 }
 0x128   :  { %v151_v36 = vpop.xlane.xlu0 %150 }
 0x129   :  { %v167_v37 = vmul.f32 %v166_v35, %v151_v36 }
 0x12b   :  { %v168_v39 = vsub.f32 %v141_v22, %v167_v37 }
 0x12d   :  { %v169_v40 = vsel %vm428_vm2, %v168_v39, 0.0 }
 0x12e   :  { %v170_v41 = vmul.f32 %v169_v40, %v169_v40 }
 0x130   :  { %v171_v42 = vsel %vm135_vm1, %v170_v41, 0.0 }
 0x131   :  { %172 = vadd.xlane.f32.xlu1 %v171_v42 }
 0x14a   :  { %191 = vperm.xlu1 %255, %v187_v43  }
 0x1a4   :  { %v173_v44 = vpop.xlane.xlu1 %172 }
 0x1a5   :  { %v174_v45 = vmul.f32 %v173_v44, %v166_v35 }
 0x1a7   :  { %v175_v46 = vadd.f32 1e-05, %v174_v45 }
 0x1a9   :  { %259 = vrsqrt.f32 %v175_v46  ;;  %vm182_vm8 = vweird.f32 %v175_v46 }
 0x1af   :  { %v260_v47 = vpop.eup %259 }
 0x1b0   :  { %v177_v48 = vmul.f32 %v260_v47, %v175_v46  ;;  %vm183_vm7 = vweird.f32 %v260_v47 }
 0x1b1   :  { %vm184_vm9 = vmor %vm182_vm8, %vm183_vm7 }
 0x1b2   :  { %v178_v49 = vmul.f32 %v260_v47, %v177_v48 }
 0x1b4   :  { %v179_v50 = vmul.f32 0.5, %v178_v49 }
 0x1b6   :  { %v180_v51 = vsub.f32 1.5, %v179_v50 }
 0x1b8   :  { %v181_v52 = vmul.f32 %v260_v47, %v180_v51 }
 0x1ba   :  { %v185_v53 = vsel %vm184_vm9, %v260_v47, %v181_v52 }
 0x1bb   :  { %v186_v54 = vmul.f32 %v185_v53, %v168_v39 }
 0x1bc   :  { %v192_v55 = vpop.permute.xlu1 %191 }
 0x1bd   :  { %v194_v57 = vmul.f32 %v192_v55, %v186_v54 }
 0x1bf   :  { %v200_v58 = vadd.f32 %v198_v56, %v194_v57 }
 0x1c1   :  { %v246_v59 = vmul.f32 -1.442695, %v200_v58 }
 0x1c3   :  { %261 = vpow2.f32 %v246_v59 }
 0x1c9   :  { %v262_v60 = vpop.eup %261 }
 0x1ca   :  { %v204_v61 = vadd.f32 1.0, %v262_v60 }
 0x1cc   :  { %263 = vrcp.f32 %v204_v61  ;;  %v216_v1 = vand.u32 2147483648, %v204_v61  ;;  %v214_v3 = vand.u32 2147483647, %v204_v61  ;;  %vm210_vm11 = vweird.f32 %v204_v61 }
 0x1ce   :  { %v217_v5 = vor.u32 1.1754944e-38, %v216_v1  ;;  %vm215_vm13 = vcmp.eq.f32.partialorder %v214_v3, 8.507059e+37 }
 0x1d2   :  { %v264_v62 = vpop.eup %263 }
 0x1d3   :  { %v206_v63 = vmul.f32 %v264_v62, %v204_v61  ;;  %vm211_vm10 = vweird.f32 %v264_v62 }
 0x1d4   :  { %vm212_vm12 = vmor %vm210_vm11, %vm211_vm10 }
 0x1d5   :  { %v207_v0 = vsub.f32 1.0, %v206_v63 }
 0x1d7   :  { %v208_v2 = vmul.f32 %v264_v62, %v207_v0 }
 0x1d9   :  { %v209_v4 = vadd.f32 %v264_v62, %v208_v2 }
 0x1db   :  { %v213_v6 = vsel %vm212_vm12, %v264_v62, %v209_v4 }
 0x1dc   :  { %v218_v7 = vsel %vm215_vm13, %v217_v5, %v213_v6 }
 0x1dd   :  { %220 = vst.msk [vmem:[#allocation11] sm:$0x3] %vm135_vm1, %v218_v7 }
 0x1de   :  { %231 = dma.vmem_to_hbm [thread:$0]  %s227_s7, 32, %s229_s16, [#allocation6]  }
 0x1df   :  { %355 = dma.done.wait [#allocation6], 32  }
 0x1e0   :  { %356 = vsyncadd [#allocation6], 4294967264 }
 0x1e1   :  { %236 = vsyncpa [#allocation5], 1 }
 0x1e2   :  { %237 = vsyncpa [#allocation10], 1 }
 0x1e3   :  { %238 = vsyncpa [#allocation6], 1 }
 0x1e4   :  { %239 = vsyncpa [#allocation7], 1 }

</bundles_post_ra>
